<compile_context>
chip_gen: v6e
topology: v6e:2x2x1
jax: 0.10.0
libtpu: 0.0.40
codegen_flags: <defaults>
</compile_context>

<pallas_src>
import jax
import jax.numpy as jnp
from jax.experimental import pallas as pl
from jax.experimental.pallas import tpu as pltpu


# --------------------------------------------------------------------------
# Fused kernel: stage1 matmul + bias + ReLU -> stage2 matmul + bias + ReLU
# Operates on channel-major tiles: x (m, TC) -> out (4*n_out, TC).
# --------------------------------------------------------------------------
def _fused_decoder_kernel(x_ref, w1_ref, b1_ref, w2_ref, b2_ref, o_ref):
    x = x_ref[0].astype(jnp.float32)                               # (m, TC)
    # stage 1: conv1x1 (BN1 scale folded into w1) + shift + ReLU
    y = jnp.dot(w1_ref[...], x, preferred_element_type=jnp.float32)  # (4m, TC)
    y = jnp.maximum(y + b1_ref[...], 0.0)
    # stage 2: block-diagonal conv1x1 over the 4 pixel-shuffle groups
    z = jnp.dot(w2_ref[...], y, preferred_element_type=jnp.float32)  # (4n, TC)
    z = jnp.maximum(z + b2_ref[...], 0.0)
    o_ref[0] = z.astype(o_ref.dtype)


# --------------------------------------------------------------------------
# Parameter preparation (done once, outside the kernel)
# --------------------------------------------------------------------------
def fold_bn(gamma, beta, running_mean, running_var, eps=1e-5):
    scale = gamma / jnp.sqrt(running_var + eps)
    shift = beta - running_mean * scale
    return scale, shift


def prepare_params(w1_pt, bn1, w2_pt, bn2, eps=1e-5):
    """w1_pt: PyTorch Conv2d(m,4m,1) weight (4m, m[,1,1]); w2_pt: (n, m[,1,1]).
    bn1/bn2: (gamma, beta, running_mean, running_var)."""
    w1 = jnp.asarray(w1_pt, jnp.float32).reshape(w1_pt.shape[0], w1_pt.shape[1])
    w2 = jnp.asarray(w2_pt, jnp.float32).reshape(w2_pt.shape[0], w2_pt.shape[1])
    m = w1.shape[1]
    n_out = w2.shape[0]
    assert w1.shape[0] == 4 * m and w2.shape[1] == m

    s1, b1 = fold_bn(*bn1, eps)
    s2, b2 = fold_bn(*bn2, eps)

    # Permute stage-1 output channels to pixel-shuffle-group-major order:
    # group g = i*2 + j gets original channels c*4 + g (PyTorch PixelShuffle).
    g = jnp.arange(4)
    c = jnp.arange(m)
    perm = (c[None, :] * 4 + g[:, None]).reshape(-1)               # (4m,)

    w1_perm = w1[perm] * s1[perm][:, None]                         # (4m, m)
    b1_perm = b1[perm][:, None]                                    # (4m, 1)

    # Stage-2 block-diagonal weight: one W2 block per shuffle group.
    w2_blk = jnp.kron(jnp.eye(4, dtype=jnp.float32), w2)           # (4n, 4m)
    w2_blk = w2_blk * jnp.tile(s2, 4)[:, None]
    b2_t = jnp.tile(b2, 4)[:, None]                                # (4n, 1)

    return {"w1": w1_perm, "b1": b1_perm, "w2": w2_blk, "b2": b2_t}


# --------------------------------------------------------------------------
# Forward wrapper (NCHW in, NCHW out)
# --------------------------------------------------------------------------
def decoder_block_forward(x_nchw, params, *, tile_cols=512):
    N, m, H, W = x_nchw.shape
    assert params["w1"].shape[1] == m
    c_out4 = params["w2"].shape[0]
    n_out = c_out4 // 4
    HW = H * W

    # Lane tiling: spatial axis is the 128-lane axis; pad instead of asserting.
    tc = max(128, min(int(tile_cols), pl.cdiv(HW, 128) * 128))
    HW_pad = pl.cdiv(HW, tc) * tc

    x3 = x_nchw.reshape(N, m, HW)                  # channel-major, no transpose
    if HW_pad != HW:
        x3 = jnp.pad(x3, ((0, 0), (0, 0), (0, HW_pad - HW)))
    out_dtype = x3.dtype

    grid = (N, HW_pad // tc)

    in_item = x3.dtype.itemsize
    out_item = jnp.dtype(out_dtype).itemsize
    w_bytes = 4 * int(params["w1"].size + params["b1"].size
                      + params["w2"].size + params["b2"].size)
    block_bytes = 2 * (m * tc * in_item + c_out4 * tc * out_item) + 2 * w_bytes
    vmem_limit = int(min(32 * 2**20, max(4 * 2**20, 4 * block_bytes)))

    flops = 2 * N * HW_pad * (4 * m * m + c_out4 * 4 * m)
    bytes_accessed = int(x3.size) * in_item + N * c_out4 * HW_pad * out_item + w_bytes
    cost = pl.CostEstimate(flops=flops, transcendentals=0,
                           bytes_accessed=bytes_accessed)

    out = pl.pallas_call(
        _fused_decoder_kernel,
        out_shape=jax.ShapeDtypeStruct((N, c_out4, HW_pad), out_dtype),
        grid_spec=pltpu.PrefetchScalarGridSpec(
            num_scalar_prefetch=0,
            grid=grid,
            in_specs=[
                pl.BlockSpec((1, m, tc), lambda b, t: (b, 0, t)),
                pl.BlockSpec((4 * m, m), lambda b, t: (0, 0)),
                pl.BlockSpec((4 * m, 1), lambda b, t: (0, 0)),
                pl.BlockSpec((c_out4, 4 * m), lambda b, t: (0, 0)),
                pl.BlockSpec((c_out4, 1), lambda b, t: (0, 0)),
            ],
            out_specs=pl.BlockSpec((1, c_out4, tc), lambda b, t: (b, 0, t)),
        ),
        compiler_params=pltpu.CompilerParams(
            dimension_semantics=("parallel", "parallel"),
            vmem_limit_bytes=vmem_limit,
        ),
        cost_estimate=cost,
    )(x3, params["w1"], params["b1"], params["w2"], params["b2"])

    # Drop spatial padding, then do the PixelShuffle spatial interleave
    # (output-layout plumbing only; all compute already happened in-kernel).
    out = out[:, :, :HW]
    out = out.reshape(N, 2, 2, n_out, H, W)        # (n, i, j, co, h, w)
    out = out.transpose(0, 3, 4, 1, 5, 2)          # (n, co, h, i, w, j)
    return out.reshape(N, n_out, 2 * H, 2 * W)


# --------------------------------------------------------------------------
# Plain-JAX reference (unfused, NCHW) for validation
# --------------------------------------------------------------------------
def reference_forward(x, w1, bn1, w2, bn2, eps=1e-5):
    g1, be1, m1, v1 = bn1
    g2, be2, m2, v2 = bn2
    s1 = g1 / jnp.sqrt(v1 + eps)
    s2 = g2 / jnp.sqrt(v2 + eps)

    y = jnp.einsum("oc,nchw->nohw", w1, x)
    y = y * s1[None, :, None, None] + (be1 - m1 * s1)[None, :, None, None]
    y = jnp.maximum(y, 0.0)

    # PixelShuffle(2), NCHW
    Nn, C4, H, W = y.shape
    C = C4 // 4
    y = y.reshape(Nn, C, 2, 2, H, W).transpose(0, 1, 4, 2, 5, 3)
    y = y.reshape(Nn, C, 2 * H, 2 * W)

    z = jnp.einsum("oc,nchw->nohw", w2, y)
    z = z * s2[None, :, None, None] + (be2 - m2 * s2)[None, :, None, None]
    return jnp.maximum(z, 0.0)


if __name__ == "__main__":
    key = jax.random.PRNGKey(0)
    m, n_out = 4, 8
    N, H, W = 2, 16, 16

    ks = jax.random.split(key, 11)
    x = jax.random.normal(ks[0], (N, m, H, W), jnp.float32)

    # PyTorch-layout Conv2d weights (out, in, 1, 1)
    w1_pt = 0.3 * jax.random.normal(ks[1], (4 * m, m, 1, 1), jnp.float32)
    w2_pt = 0.3 * jax.random.normal(ks[2], (n_out, m, 1, 1), jnp.float32)

    # BatchNorm params with non-trivial eval-mode running stats
    bn1 = (1.0 + 0.1 * jax.random.normal(ks[3], (4 * m,)),
           0.1 * jax.random.normal(ks[4], (4 * m,)),
           0.1 * jax.random.normal(ks[5], (4 * m,)),
           0.5 + jax.random.uniform(ks[6], (4 * m,)))
    bn2 = (1.0 + 0.1 * jax.random.normal(ks[7], (n_out,)),
           0.1 * jax.random.normal(ks[8], (n_out,)),
           0.1 * jax.random.normal(ks[9], (n_out,)),
           0.5 + jax.random.uniform(ks[10], (n_out,)))

    params = prepare_params(w1_pt, bn1, w2_pt, bn2)
    ref = reference_forward(x, w1_pt.reshape(4 * m, m), bn1,
                            w2_pt.reshape(n_out, m), bn2)

    # f32 activation path (tight tolerance)
    out = jax.block_until_ready(decoder_block_forward(x, params))
    assert out.shape == (N, n_out, 2 * H, 2 * W), out.shape
    assert jnp.allclose(out, ref, atol=1e-4, rtol=1e-4), "f32 mismatch vs reference"

    # bf16 activation-I/O path (bandwidth-optimized for v6e/v7x; loose tolerance)
    out_bf16 = jax.block_until_ready(
        decoder_block_forward(x.astype(jnp.bfloat16), params))
    assert out_bf16.dtype == jnp.bfloat16
    assert jnp.allclose(out_bf16.astype(jnp.float32), ref,
                        atol=1e-1, rtol=5e-2), "bf16 mismatch vs reference"

    print("KERNEL_OK")
</pallas_src>

<mosaic_0001>
module attributes {stable_mosaic.version = 11 : i64} {
  func.func @_fused_decoder_kernel(%arg0: i32, %arg1: i32, %arg2: memref<1x4x256xf32, #tpu.memory_space<vmem>>, %arg3: memref<16x4xf32, #tpu.memory_space<vmem>>, %arg4: memref<16x1xf32, #tpu.memory_space<vmem>>, %arg5: memref<32x16xf32, #tpu.memory_space<vmem>>, %arg6: memref<32x1xf32, #tpu.memory_space<vmem>>, %arg7: memref<1x32x256xf32, #tpu.memory_space<vmem>>) attributes {dimension_semantics = [#tpu.dimension_semantics<parallel>, #tpu.dimension_semantics<parallel>], iteration_bounds = array<i64: 2, 1>, scalar_prefetch = 0 : i64, scratch_operands = 0 : i64, tpu.core_type = #tpu.core_type<tc>, window_params = [{transform_indices = @transform_0, window_bounds = array<i64: 1, 4, 256>}, {pipeline_mode = #tpu.pipeline_mode<synchronous>, transform_indices = @transform_1, window_bounds = array<i64: 16, 4>}, {pipeline_mode = #tpu.pipeline_mode<synchronous>, transform_indices = @transform_2, window_bounds = array<i64: 16, 1>}, {pipeline_mode = #tpu.pipeline_mode<synchronous>, transform_indices = @transform_3, window_bounds = array<i64: 32, 16>}, {pipeline_mode = #tpu.pipeline_mode<synchronous>, transform_indices = @transform_4, window_bounds = array<i64: 32, 1>}, {transform_indices = @transform_5, window_bounds = array<i64: 1, 32, 256>}]} {
    %c0 = arith.constant 0 : index
    %c0_0 = arith.constant 0 : index
    %c0_1 = arith.constant 0 : index
    %0 = vector.load %arg2[%c0, %c0_0, %c0_1] : memref<1x4x256xf32, #tpu.memory_space<vmem>>, vector<1x4x256xf32>
    %1 = vector.shape_cast %0 : vector<1x4x256xf32> to vector<4x256xf32>
    %c0_2 = arith.constant 0 : index
    %c0_3 = arith.constant 0 : index
    %2 = vector.load %arg3[%c0_2, %c0_3] : memref<16x4xf32, #tpu.memory_space<vmem>>, vector<16x4xf32>
    %cst = arith.constant dense<0.000000e+00> : vector<16x256xf32>
    %3 = tpu.matmul %2, %1, %cst {dimension_numbers = #tpu.dot_dimension_numbers<[1], [0], [0], [1], [0, 0, 1, 1], [], []>} : vector<16x4xf32>, vector<4x256xf32>, vector<16x256xf32> -> vector<16x256xf32>
    %c0_4 = arith.constant 0 : index
    %c0_5 = arith.constant 0 : index
    %4 = vector.load %arg4[%c0_4, %c0_5] : memref<16x1xf32, #tpu.memory_space<vmem>>, vector<16x1xf32>
    %5 = vector.broadcast %4 : vector<16x1xf32> to vector<16x256xf32>
    %6 = arith.addf %3, %5 : vector<16x256xf32>
    %cst_6 = arith.constant 0.000000e+00 : f32
    %7 = vector.broadcast %cst_6 : f32 to vector<16x256xf32>
    %8 = arith.maximumf %6, %7 : vector<16x256xf32>
    %c0_7 = arith.constant 0 : index
    %c0_8 = arith.constant 0 : index
    %9 = vector.load %arg5[%c0_7, %c0_8] : memref<32x16xf32, #tpu.memory_space<vmem>>, vector<32x16xf32>
    %cst_9 = arith.constant dense<0.000000e+00> : vector<32x256xf32>
    %10 = tpu.matmul %9, %8, %cst_9 {dimension_numbers = #tpu.dot_dimension_numbers<[1], [0], [0], [1], [0, 0, 1, 1], [], []>} : vector<32x16xf32>, vector<16x256xf32>, vector<32x256xf32> -> vector<32x256xf32>
    %c0_10 = arith.constant 0 : index
    %c0_11 = arith.constant 0 : index
    %11 = vector.load %arg6[%c0_10, %c0_11] : memref<32x1xf32, #tpu.memory_space<vmem>>, vector<32x1xf32>
    %12 = vector.broadcast %11 : vector<32x1xf32> to vector<32x256xf32>
    %13 = arith.addf %10, %12 : vector<32x256xf32>
    %cst_12 = arith.constant 0.000000e+00 : f32
    %14 = vector.broadcast %cst_12 : f32 to vector<32x256xf32>
    %15 = arith.maximumf %13, %14 : vector<32x256xf32>
    %c0_13 = arith.constant 0 : index
    %c0_14 = arith.constant 0 : index
    %c0_15 = arith.constant 0 : index
    %16 = vector.load %arg7[%c0_13, %c0_14, %c0_15] : memref<1x32x256xf32, #tpu.memory_space<vmem>>, vector<1x32x256xf32>
    %17 = vector.shape_cast %16 : vector<1x32x256xf32> to vector<32x256xf32>
    %18 = vector.shape_cast %15 : vector<32x256xf32> to vector<1x32x256xf32>
    tpu.vector_store %arg7[%c0_13, %c0_14, %c0_15], %18 {strides = array<i32>} : memref<1x32x256xf32, #tpu.memory_space<vmem>>, vector<1x32x256xf32>,
    return
  }
  func.func @transform_0(%arg0: i32, %arg1: i32) -> (i32, i32, i32) {
    %c0_i32 = arith.constant 0 : i32
    %c0_i32_0 = arith.constant 0 : i32
    return %arg0, %c0_i32, %arg1 : i32, i32, i32
  }
  func.func @transform_1(%arg0: i32, %arg1: i32) -> (i32, i32) {
    %c0_i32 = arith.constant 0 : i32
    %c0_i32_0 = arith.constant 0 : i32
    %c0_i32_1 = arith.constant 0 : i32
    return %c0_i32, %c0_i32_0 : i32, i32
  }
  func.func @transform_2(%arg0: i32, %arg1: i32) -> (i32, i32) {
    %c0_i32 = arith.constant 0 : i32
    %c0_i32_0 = arith.constant 0 : i32
    %c0_i32_1 = arith.constant 0 : i32
    return %c0_i32, %c0_i32_0 : i32, i32
  }
  func.func @transform_3(%arg0: i32, %arg1: i32) -> (i32, i32) {
    %c0_i32 = arith.constant 0 : i32
    %c0_i32_0 = arith.constant 0 : i32
    %c0_i32_1 = arith.constant 0 : i32
    return %c0_i32, %c0_i32_0 : i32, i32
  }
  func.func @transform_4(%arg0: i32, %arg1: i32) -> (i32, i32) {
    %c0_i32 = arith.constant 0 : i32
    %c0_i32_0 = arith.constant 0 : i32
    %c0_i32_1 = arith.constant 0 : i32
    return %c0_i32, %c0_i32_0 : i32, i32
  }
  func.func @transform_5(%arg0: i32, %arg1: i32) -> (i32, i32, i32) {
    %c0_i32 = arith.constant 0 : i32
    %c0_i32_0 = arith.constant 0 : i32
    return %arg0, %c0_i32, %arg1 : i32, i32, i32
  }
}

</mosaic_0001>

<bundles_post_ra>
// kernel: tpu_custom_call.1
= control target key start
LH: loop header
LB: loop body
LE: loop exit
PB: predicated region body
PF: predicated region fallthrough
CT: control target
= control target key end

     0   :  { %10 = vsyncpa [#allocation3], 0  ;;  %s967_s0 = inlined_call_operand.vmem [shape: f32[2,4,256], index: 0, kind: input, shape index: {}]   ;;  %s968_s1 = inlined_call_operand.vmem [shape: f32[16,4], index: 1, kind: input, shape index: {}]   ;;  %s969_s2 = inlined_call_operand.vmem [shape: f32[16,1], index: 2, kind: input, shape index: {}]   ;;  %s970_s3 = inlined_call_operand.vmem [shape: f32[32,16], index: 3, kind: input, shape index: {}]   ;;  %s971_s4 = inlined_call_operand.vmem [shape: f32[32,1], index: 4, kind: input, shape index: {}]   ;;  %s972_s5 = inlined_call_operand.hbm [shape: f32[2,32,256], index: 5, kind: output, shape index: {}]  }
   0x1   :  { %12 = vsyncpa [#allocation3 + $0x1], 0  ;;  %s807_s18 = smov 0   ;;  %s809_s19 = smov 0  }
   0x2   :  { %s811_s20 = smov 0   ;;  %s813_s21 = smov 0  }
   0x3   :  { %s815_s22 = smov 0   ;;  %s817_s23 = smov 0  }
   0x4 LB: > { %s605_s24 = sadd.s32 4294967295, %s770_s23   ;;  %s606_s25 = sadd.s32 4294967294, %s770_s23   ;;  %s770_s23 = sphi %s817_s23, %s18_s23   ;;  %s766_s22 = sphi %s815_s22, %s979_s22   ;;  %s762_s21 = sphi %s813_s21, %s978_s21   ;;  %s758_s20 = sphi %s811_s20, %s977_s20   ;;  %s754_s19 = sphi %s809_s19, %s976_s19   ;;  %s750_s18 = sphi %s807_s18, %s975_s18  }
   0x5   : > { %s30_s26 = sadd.s32 1, %s766_s22  ;;  %s151_s27 = sadd.s32 1, %s758_s20 }
   0x6   : > { %p32_p0 = scmp.ge.s32.totalorder %s30_s26, 2  ;;  %p161_p1 = scmp.ne.s32.totalorder %s758_s20, %s754_s19 }
   0x7   : > { %p162_p2 = scmp.eq.s32.totalorder %s605_s24, 1  ;;  %p167_p3 = scmp.ne.s32.totalorder %s754_s19, %s750_s18 }
   0x8   : > { %s981_s26 = smov (%p32_p0, %s30_s26), 0  ;;  %p168_p5 = scmp.eq.s32.totalorder %s606_s25, 1 }
   0x9   : > { %p847_p4 = por %p162_p2, %p161_p1  ;;  %s146_s29 = ssub.s32 %s766_s22, %s981_s26 }
   0xa   : > { %p609_p6 = scmp.ge.s32.totalorder %s770_s23, 1  ;;  %p149_p7 = scmp.eq.s32.totalorder %s146_s29, 0 }
   0xb   : > { %p854_p8 = por %p168_p5, %p167_p3  ;;  %p211_p9 = scmp.lt.s32.totalorder %s770_s23, 3 }
   0xc   : > { %s860_s6 = scalar_select %p149_p7, %s758_s20, %s151_s27  }
   0xd   : > { %p212_p10 = pnand %p609_p6, %p211_p9 }
   0xe   : > { %p244_p11 = scmp.lt.s32.totalorder (!%p212_p10), %s762_s21, 1  ;;  %s240_s29 = sand.u32 (!%p212_p10), 1, %s754_s19  }
   0xf   : > { %215 = sbr.rel (%p212_p10) target bundleno = 457 (0x1c9), region = 40  ;;  %s610_s7 = sshll.u32 (!%p212_p10), %s240_s29, 6 }
  0x10   : > { %s242_s8 = scalar_lea.vmem (!%p212_p10), [#allocation2], %s610_s7 }
  0x14   : > { %v772_v0 = vmov 0.0   ;;  %v258_v1 = vld [vmem:[%s969_s2 + $0x8] sm:$0xff]  ;;  %s245_s9 = scalar_select %p244_p11, %s762_s21, 1  ;;  %v773_v2 = vmov 0   ;;  %v257_v3 = vld [vmem:[%s969_s2] sm:$0xff]  ;;  %vm278_vm0 = vcmask 1043456  }
  0x15   : > { %347 = vmatprep.mubr.f32.mxu0 %v772_v0  ;;  %475 = vmatprep.mubr.f32.mxu1 %v772_v0  ;;  %v255_v6 = vld [vmem:[%s968_s1] sm:$0xff]  ;;  %vm271_vm1 = vcmask 31744   ;;  %v370_v7 = vld [vmem:[%s971_s4 + $0x10] sm:$0xff]  ;;  %v256_v8 = vld [vmem:[%s968_s1 + $0x8] sm:$0xff]  ;;  %vm392_vm2 = vcmask 130048  }
  0x16   : > { %691 = vset.pattern.permute.xlu0 %v773_v2  ;;  %692 = vset.pattern.permute.xlu1 %v773_v2  ;;  %s626_s10 = sshll.u32 %s245_s9, 3  ;;  %v368_v9 = vld [vmem:[%s971_s4] sm:$0xff]  ;;  %v369_v10 = vld [vmem:[%s971_s4 + $0x8] sm:$0xff]  ;;  %v371_v11 = vld [vmem:[%s971_s4 + $0x18] sm:$0xff]  ;;  %s627_s9 = sshll.u32 %s762_s21, 10 }
  0x17   : > { %266 = vperm.xlu0 %691, %v258_v1   ;;  %s251_s15 = scalar_lea.vmem %s967_s0, %s626_s10  ;;  %374 = vperm.xlu1 %692, %v368_v9   ;;  %v364_v26 = vld [vmem:[%s970_s3] sm:$0xff]  ;;  %v365_v27 = vld [vmem:[%s970_s3 + $0x8] sm:$0xff]  ;;  %v366_v28 = vld [vmem:[%s970_s3 + $0x10] sm:$0xff]  ;;  %s526_s10 = sshll.u32 %s242_s8, 4  ;;  %s918_s10 = int_to_ptr.vmem [resolvable:$true] %s526_s10 }
  0x18   : > { %v254_v4 = vld [vmem:[%s251_s15] sm:$0xff]  ;;  %v367_v29 = vld [vmem:[%s970_s3 + $0x18] sm:$0xff]  ;;  %s916_s13 = scalar_lea.hbm %s972_s5, %s627_s9  ;;  %s922_s21 = scalar_lea.sflag [#allocation3], %s240_s29 }
  0x19   : > { %v270_v5 = vcombine.high %v254_v4, %v254_v4  ;;  %s694_s14 = scalar_lea.vmem %s918_s10, 1024  ;;  %s774_s15 = smov [#allocation2]  }
  0x1a   : > { %p695_p12 = scmp.ne.s32.totalorder %s918_s10, %s694_s14  ;;  %s698_s16 = sshll.u32 %s774_s15, 4  ;;  %s699_s16 = int_to_ptr.vmem [resolvable:$false] %s698_s16 }
  0x1b   : > { %261 = vperm.xlu0 %691, %v257_v3   ;;  %613 = vmatprep.subr.msk.mxu0 %vm278_vm0, %v270_v5  ;;  %s700_s17 = scalar_lea.vmem %s699_s16, 2048  ;;  %p701_p1 = scmp.lt.s32.totalorder %s918_s10, %s699_s16 }
  0x1c   : > { %614 = vmatpush1.msk.msra.mxu0 %vm278_vm0, %v254_v4  ;;  %379 = vperm.xlu1 %692, %v369_v10   ;;  %p696_p13 = pnand %p695_p12, %p847_p4  ;;  %p702_p2 = scmp.lt.s32.totalorder %s700_s17, %s694_s14 }
  0x1d   : > { %615 = vmatmul.mubr.msk.f32.vlgmr.msra.gmra.mxu0 %vm271_vm1, %v255_v6 }
  0x1e   : > { %353 = vmatprep.mubr.f32.mxu0 %v772_v0  ;;  %p697_p0 = pneg %p696_p13  ;;  %p703_p3 = por %p702_p2, %p701_p1 }
  0x1f   : > { %384 = vperm.xlu0 %691, %v370_v7  }
  0x20   : > { %389 = vperm.xlu1 %692, %v371_v11   ;;  %p704_p5 = pnand %p703_p3, %p697_p0 }
  0x21   : > { %616 = vmatmul.mubr.msk.f32.gmra.mxu0 %vm271_vm1, %v256_v8 }
  0x22   : > { %469 = vmatprep.mubr.f32.mxu0 %v772_v0 }
  0x92   : > { %v267_v12 = vpop.permute.xlu0 %266  ;;  %v375_v30 = vpop.permute.xlu1 %374 }
  0x96   : > { %v262_v16 = vpop.permute.xlu0 %261 }
  0x97   : > { %v380_v31 = vpop.permute.xlu1 %379 }
  0x9a   : > { %v385_v42 = vpop.permute.xlu0 %384 }
  0x9b   : > { %v390_v50 = vpop.permute.xlu1 %389 }
  0xdd   : > { %v349_v13 = vpop.f32.mrf.mxu0 }
  0xde   : > { %v350_v21 = vadd.f32 %v349_v13, %v262_v16 }
  0xdf   : > { %v351_v14 = vpop.f32.mrf.mxu0 }
  0xe0   : > { %v352_v19 = vadd.f32 %v351_v14, %v262_v16  ;;  %v360_v25 = vmax.f32 %v350_v21, 0.0 }
  0xe1   : > { %v355_v15 = vpop.f32.mrf.mxu0 }
  0xe2   : > { %v356_v17 = vadd.f32 %v355_v15, %v267_v12  ;;  %v361_v24 = vmax.f32 %v352_v19, 0.0 }
  0xe3   : > { %v357_v18 = vpop.f32.mrf.mxu0 }
  0xe4   : > { %v358_v20 = vadd.f32 %v357_v18, %v267_v12  ;;  %v362_v23 = vmax.f32 %v356_v17, 0.0 }
  0xe6   : > { %v363_v22 = vmax.f32 %v358_v20, 0.0 }
  0xe8   : > { %433 = vmatprep.subr.mxu0 %v363_v22  ;;  %628 = vmatprep.subr.mxu1 %v363_v22 }
  0xe9   : > { %434 = vmatpush1.msra.mxu0 %v362_v23  ;;  %630 = vmatpush1.msra.mxu1 %v362_v23 }
  0xea   : > { %435 = vmatprep.subr.mxu0 %v361_v24  ;;  %629 = vmatprep.subr.mxu1 %v361_v24 }
  0xeb   : > { %436 = vmatpush1.msra.mxu0 %v360_v25  ;;  %631 = vmatpush1.msra.mxu1 %v360_v25 }
  0xec   : > { %617 = vmatmul.mubr.msk.f32.vlgmr.msra.gmra.mxu0 %vm392_vm2, %v364_v26  ;;  %618 = vmatmul.mubr.msk.f32.vlgmr.msra.gmra.mxu1 %vm392_vm2, %v365_v27 }
  0xed   : > { %481 = vmatprep.mubr.f32.mxu1 %v772_v0 }
  0xf0   : > { %619 = vmatmul.mubr.msk.f32.gmra.mxu1 %vm392_vm2, %v366_v28 }
  0xf1   : > { %487 = vmatprep.mubr.f32.mxu1 %v772_v0 }
  0xf4   : > { %620 = vmatmul.mubr.msk.f32.gmra.mxu1 %vm392_vm2, %v367_v29 }
 0x1ac   : > { %v471_v32 = vpop.f32.mrf.mxu0  ;;  %v477_v33 = vpop.f32.mrf.mxu1 }
 0x1ad   : > { %v472_v34 = vadd.f32 %v471_v32, %v375_v30  ;;  %v478_v35 = vadd.f32 %v477_v33, %v380_v31 }
 0x1ae   : > { %v473_v36 = vpop.f32.mrf.mxu0  ;;  %v479_v37 = vpop.f32.mrf.mxu1 }
 0x1af   : > { %v494_v38 = vmax.f32 %v472_v34, 0.0  ;;  %v496_v39 = vmax.f32 %v478_v35, 0.0  ;;  %v474_v40 = vadd.f32 %v473_v36, %v375_v30  ;;  %v480_v41 = vadd.f32 %v479_v37, %v380_v31 }
 0x1b0   : > { %v483_v43 = vpop.f32.mrf.mxu1 }
 0x1b1   : > { %502 = vst [vmem:[%s242_s8] sm:$0xff] %v494_v38  ;;  %504 = vst [vmem:[%s242_s8 + $0x10] sm:$0xff] %v496_v39  ;;  %v495_v44 = vmax.f32 %v474_v40, 0.0  ;;  %v497_v45 = vmax.f32 %v480_v41, 0.0  ;;  %v484_v46 = vadd.f32 %v483_v43, %v385_v42 }
 0x1b2   : > { %v485_v47 = vpop.f32.mrf.mxu1 }
 0x1b3   : > { %503 = vst [vmem:[%s242_s8 + $0x8] sm:$0xff] %v495_v44  ;;  %505 = vst [vmem:[%s242_s8 + $0x18] sm:$0xff] %v497_v45  ;;  %v498_v48 = vmax.f32 %v484_v46, 0.0  ;;  %v486_v49 = vadd.f32 %v485_v47, %v385_v42 }
 0x1b4   : > { %v489_v51 = vpop.f32.mrf.mxu1 }
 0x1b5   : > { %506 = vst [vmem:[%s242_s8 + $0x20] sm:$0xff] %v498_v48  ;;  %v499_v52 = vmax.f32 %v486_v49, 0.0  ;;  %v490_v53 = vadd.f32 %v489_v51, %v390_v50 }
 0x1b6   : > { %v491_v54 = vpop.f32.mrf.mxu1 }
 0x1b7   : > { %507 = vst [vmem:[%s242_s8 + $0x28] sm:$0xff] %v499_v52  ;;  %v500_v55 = vmax.f32 %v490_v53, 0.0  ;;  %v492_v56 = vadd.f32 %v491_v54, %v390_v50 }
 0x1b9   : > { %508 = vst [vmem:[%s242_s8 + $0x30] sm:$0xff] %v500_v55  ;;  %v501_v57 = vmax.f32 %v492_v56, 0.0 }
 0x1bb   : > { %509 = vst [vmem:[%s242_s8 + $0x38] sm:$0xff] %v501_v57 }
 0x1bc   : > { %707 = shalt.err (!%p704_p5)
}
 0x1bd   : > { %s708_s24 = scalar_lea.hbm %s916_s13, 1024  ;;  %s712_s29 = scalar_lea.hbm %s972_s5, 2048 }
 0x1be   : > { %p709_p6 = scmp.ne.s32.totalorder %s916_s13, %s708_s24  ;;  %p713_p10 = scmp.lt.s32.totalorder %s916_s13, %s972_s5 }
 0x1bf   : > { %p714_p11 = scmp.lt.s32.totalorder %s712_s29, %s708_s24 }
 0x1c0   : > { %p710_p7 = pnand %p709_p6, %p847_p4 }
 0x1c1   : > { %p715_p12 = por %p714_p11, %p713_p10 }
 0x1c2   : > { %p711_p9 = pneg %p710_p7 }
 0x1c4   : > { %p716_p13 = pnand %p715_p12, %p711_p9 }
 0x1c6   : > { %719 = shalt.err (!%p716_p13)
}
 0x1c7   : > { %s775_s9 = smov 256   ;;  %s776_s11 = smov 16  }
 0x1c8   : > { %632 = dma.vmem_to_hbm [thread:$0]  (%p847_p4), %s918_s10, 1024, %s916_s13, %s922_s21, %s775_s9, %s775_s9, %s776_s11  }
 0x1c9 PF: > { %p638_p0 = scmp.ge.s32.totalorder %s770_s23, 2  ;;  %s541_s12 = sand.u32 1, %s750_s18  }
 0x1ca   : > { %s542_s14 = scalar_lea.sflag [#allocation3], %s541_s12 }
 0x1cb   : > { %p635_p1 = pnand %p638_p0, %p854_p8 }
 0x1cd   : > { %p636_p2 = pneg %p635_p1 }
 0x1cf   : > { %745 = dma.done.wait (%p636_p2), %s542_s14, 1024  }
 0x1d0   : > { %747 = vsyncadd (%p636_p2), %s542_s14, 4294966272  ;;  %s18_s23 = sadd.s32 1, %s770_s23   ;;  %s975_s18 = smov %s754_s19 }
 0x1d1   : > { %p15_p3 = scmp.ge.s32.totalorder %s18_s23, 4   ;;  %s976_s19 = smov %s758_s20 }
 0x1d2   : > { %s977_s20 = smov %s860_s6  ;;  %s978_s21 = smov %s766_s22 }
 0x1d3   : > { %s979_s22 = smov %s981_s26  ;;  %17 = sbr.rel (!%p15_p3) target bundleno = 4 (0x4), region = 75 }
 0x1d8   :  { %547 = vsyncpa [#allocation3], 1 }
 0x1d9   :  { %549 = vsyncpa [#allocation3 + $0x1], 1 }

</bundles_post_ra>
